<compile_context>
chip_gen: v5e
topology: v5e:2x2
jax: 0.10.0
libtpu: 0.0.40
codegen_flags: <defaults>
</compile_context>

<pallas_src>
import jax
import jax.numpy as jnp
from jax.experimental import pallas as pl
from jax.experimental.pallas import tpu as pltpu

_LANE = 128


def _multi_io_kernel(params_ref, x0_ref, x1_ref, out_ref):
    # params (SMEM, shape (6,)): [a00, a01, c0, a10, a11, c1]
    #   out_j = x0 * a_j0 + x1 * a_j1 + c_j
    a00 = params_ref[0]
    a01 = params_ref[1]
    c0 = params_ref[2]
    a10 = params_ref[3]
    a11 = params_ref[4]
    c1 = params_ref[5]

    x0 = x0_ref[...]                       # (TR, 128) lane-dense tile
    x1 = x1_ref[...]
    out_ref[0] = x0 * a00 + x1 * a01 + c0  # output head 0
    out_ref[1] = x0 * a10 + x1 * a11 + c1  # output head 1


def multi_io_model(x0, x1, w_in, b_in, w_out, b_out):
    """Pallas forward of MultiIOModel.

    x0, x1 : (N, 1) f32 inputs
    w_in   : (2,)   weights of the two input Linear(1,1) layers
    b_in   : (2,)   biases  of the two input Linear(1,1) layers
    w_out  : (2, 2) weights of the two output Linear(2,1) layers (row j = head j)
    b_out  : (2,)   biases  of the two output Linear(2,1) layers
    Returns [out0, out1], each (N, 1) f32.
    """
    n = x0.shape[0]
    assert x0.shape == (n, 1) and x1.shape == (n, 1)

    # Fold three scalar affines into one per output head (done once, on host).
    a = w_out * w_in[None, :]                          # (2, 2)
    c = w_out @ b_in + b_out                           # (2,)
    params = jnp.stack(
        [a[0, 0], a[0, 1], c[0], a[1, 0], a[1, 1], c[1]]
    ).astype(jnp.float32)

    # Lane-dense layout: flatten -> pad -> (rows_p, 128).
    rows = -(-n // _LANE)
    rows8 = ((rows + 7) // 8) * 8            # sublane multiple of 8
    tr = min(1024, rows8)                    # row tile: <=512 KiB f32 per input block
    rows_p = ((rows8 + tr - 1) // tr) * tr   # grid divides evenly
    total_p = rows_p * _LANE

    def to_dense(x):
        flat = x.reshape(-1)
        flat = jnp.pad(flat, (0, total_p - n))
        return flat.reshape(rows_p, _LANE)

    x0d = to_dense(x0)
    x1d = to_dense(x1)

    num_tiles = rows_p // tr
    cost = pl.CostEstimate(
        flops=8 * total_p,                   # 2 heads x (2 mul + 2 add) per element
        transcendentals=0,
        bytes_accessed=4 * 4 * total_p,      # 2 inputs read + 2 outputs written, f32
    )

    packed = pl.pallas_call(
        _multi_io_kernel,
        out_shape=jax.ShapeDtypeStruct((2, rows_p, _LANE), jnp.float32),
        grid=(num_tiles,),
        in_specs=[
            pl.BlockSpec(memory_space=pltpu.SMEM),          # folded scalar params
            pl.BlockSpec((tr, _LANE), lambda i: (i, 0)),    # x0 row-tile
            pl.BlockSpec((tr, _LANE), lambda i: (i, 0)),    # x1 row-tile
        ],
        out_specs=pl.BlockSpec((2, tr, _LANE), lambda i: (0, i, 0)),
        compiler_params=pltpu.CompilerParams(
            dimension_semantics=("parallel",),              # megacore on v7x
        ),
        cost_estimate=cost,
    )(params, x0d, x1d)

    out0 = packed[0].reshape(-1)[:n].reshape(n, 1)
    out1 = packed[1].reshape(-1)[:n].reshape(n, 1)
    return [out0, out1]


def _reference(x0, x1, w_in, b_in, w_out, b_out):
    h0 = x0 * w_in[0] + b_in[0]
    h1 = x1 * w_in[1] + b_in[1]
    h = jnp.concatenate([h0, h1], axis=1)                   # (N, 2)
    return [h @ w_out[j][:, None] + b_out[j] for j in range(2)]


if __name__ == "__main__":
    key = jax.random.PRNGKey(0)
    ks = jax.random.split(key, 6)

    n = 8
    x0 = jax.random.normal(ks[0], (n, 1), jnp.float32)
    x1 = jax.random.normal(ks[1], (n, 1), jnp.float32)

    # Deterministic params, mimicking PyTorch default Linear init bounds:
    # Linear(1,1): bound 1/sqrt(1) = 1 ; Linear(2,1): bound 1/sqrt(2).
    w_in = jax.random.uniform(ks[2], (2,), jnp.float32, minval=-1.0, maxval=1.0)
    b_in = jax.random.uniform(ks[3], (2,), jnp.float32, minval=-1.0, maxval=1.0)
    bound = 2.0 ** -0.5
    w_out = jax.random.uniform(ks[4], (2, 2), jnp.float32, minval=-bound, maxval=bound)
    b_out = jax.random.uniform(ks[5], (2,), jnp.float32, minval=-bound, maxval=bound)

    outs = multi_io_model(x0, x1, w_in, b_in, w_out, b_out)
    jax.block_until_ready(outs)

    refs = _reference(x0, x1, w_in, b_in, w_out, b_out)
    for o, r in zip(outs, refs):
        assert o.shape == r.shape
        assert jnp.allclose(o, r, atol=1e-5)
    print("KERNEL_OK")
</pallas_src>

<mosaic_0001>
module attributes {stable_mosaic.version = 11 : i64} {
  func.func @_multi_io_kernel(%arg0: i32, %arg1: memref<6xf32, #tpu.memory_space<smem>>, %arg2: memref<8x128xf32, #tpu.memory_space<vmem>>, %arg3: memref<8x128xf32, #tpu.memory_space<vmem>>, %arg4: memref<2x8x128xf32, #tpu.memory_space<vmem>>) attributes {dimension_semantics = [#tpu.dimension_semantics<parallel>], iteration_bounds = array<i64: 1>, scalar_prefetch = 0 : i64, scratch_operands = 0 : i64, tpu.core_type = #tpu.core_type<tc>, window_params = [{transform_indices = @transform_0, window_bounds = array<i64: 6>}, {transform_indices = @transform_1, window_bounds = array<i64: 8, 128>}, {transform_indices = @transform_2, window_bounds = array<i64: 8, 128>}, {transform_indices = @transform_3, window_bounds = array<i64: 2, 8, 128>}]} {
    %c0 = arith.constant 0 : index
    %0 = memref.load %arg1[%c0] : memref<6xf32, #tpu.memory_space<smem>>
    %c1 = arith.constant 1 : index
    %1 = memref.load %arg1[%c1] : memref<6xf32, #tpu.memory_space<smem>>
    %c2 = arith.constant 2 : index
    %2 = memref.load %arg1[%c2] : memref<6xf32, #tpu.memory_space<smem>>
    %c3 = arith.constant 3 : index
    %3 = memref.load %arg1[%c3] : memref<6xf32, #tpu.memory_space<smem>>
    %c4 = arith.constant 4 : index
    %4 = memref.load %arg1[%c4] : memref<6xf32, #tpu.memory_space<smem>>
    %c5 = arith.constant 5 : index
    %5 = memref.load %arg1[%c5] : memref<6xf32, #tpu.memory_space<smem>>
    %c0_0 = arith.constant 0 : index
    %c0_1 = arith.constant 0 : index
    %6 = vector.load %arg2[%c0_0, %c0_1] : memref<8x128xf32, #tpu.memory_space<vmem>>, vector<8x128xf32>
    %c0_2 = arith.constant 0 : index
    %c0_3 = arith.constant 0 : index
    %7 = vector.load %arg3[%c0_2, %c0_3] : memref<8x128xf32, #tpu.memory_space<vmem>>, vector<8x128xf32>
    %8 = vector.broadcast %0 : f32 to vector<8x128xf32>
    %9 = arith.mulf %6, %8 : vector<8x128xf32>
    %10 = vector.broadcast %1 : f32 to vector<8x128xf32>
    %11 = arith.mulf %7, %10 : vector<8x128xf32>
    %12 = arith.addf %9, %11 : vector<8x128xf32>
    %13 = vector.broadcast %2 : f32 to vector<8x128xf32>
    %14 = arith.addf %12, %13 : vector<8x128xf32>
    %c0_4 = arith.constant 0 : index
    %c0_5 = arith.constant 0 : index
    %c0_6 = arith.constant 0 : index
    %15 = vector.load %arg4[%c0_4, %c0_5, %c0_6] : memref<2x8x128xf32, #tpu.memory_space<vmem>>, vector<1x8x128xf32>
    %16 = vector.shape_cast %15 : vector<1x8x128xf32> to vector<8x128xf32>
    %17 = vector.shape_cast %14 : vector<8x128xf32> to vector<1x8x128xf32>
    tpu.vector_store %arg4[%c0_4, %c0_5, %c0_6], %17 {strides = array<i32>} : memref<2x8x128xf32, #tpu.memory_space<vmem>>, vector<1x8x128xf32>,
    %18 = vector.broadcast %3 : f32 to vector<8x128xf32>
    %19 = arith.mulf %6, %18 : vector<8x128xf32>
    %20 = vector.broadcast %4 : f32 to vector<8x128xf32>
    %21 = arith.mulf %7, %20 : vector<8x128xf32>
    %22 = arith.addf %19, %21 : vector<8x128xf32>
    %23 = vector.broadcast %5 : f32 to vector<8x128xf32>
    %24 = arith.addf %22, %23 : vector<8x128xf32>
    %c1_7 = arith.constant 1 : index
    %c0_8 = arith.constant 0 : index
    %c0_9 = arith.constant 0 : index
    %25 = vector.load %arg4[%c1_7, %c0_8, %c0_9] : memref<2x8x128xf32, #tpu.memory_space<vmem>>, vector<1x8x128xf32>
    %26 = vector.shape_cast %25 : vector<1x8x128xf32> to vector<8x128xf32>
    %27 = vector.shape_cast %24 : vector<8x128xf32> to vector<1x8x128xf32>
    tpu.vector_store %arg4[%c1_7, %c0_8, %c0_9], %27 {strides = array<i32>} : memref<2x8x128xf32, #tpu.memory_space<vmem>>, vector<1x8x128xf32>,
    return
  }
  func.func @transform_0(%arg0: i32) -> i32 {
    %c0_i32 = arith.constant 0 : i32
    %c0_i32_0 = arith.constant 0 : i32
    return %c0_i32 : i32
  }
  func.func @transform_1(%arg0: i32) -> (i32, i32) {
    %c0_i32 = arith.constant 0 : i32
    %c0_i32_0 = arith.constant 0 : i32
    return %arg0, %c0_i32 : i32, i32
  }
  func.func @transform_2(%arg0: i32) -> (i32, i32) {
    %c0_i32 = arith.constant 0 : i32
    %c0_i32_0 = arith.constant 0 : i32
    return %arg0, %c0_i32 : i32, i32
  }
  func.func @transform_3(%arg0: i32) -> (i32, i32, i32) {
    %c0_i32 = arith.constant 0 : i32
    %c0_i32_0 = arith.constant 0 : i32
    %c0_i32_1 = arith.constant 0 : i32
    return %c0_i32, %arg0, %c0_i32_0 : i32, i32, i32
  }
}

</mosaic_0001>

<bundles_post_ra>
// kernel: tpu_custom_call.1
= control target key start
LH: loop header
LB: loop body
LE: loop exit
PB: predicated region body
PF: predicated region fallthrough
CT: control target
= control target key end

     0   :  { %8 = vsyncpa [#allocation5], 0  ;;  %s243_s0 = inlined_call_operand.hbm [shape: f32[6], index: 0, kind: input, shape index: {}]   ;;  %s244_s1 = inlined_call_operand.hbm [shape: f32[8,128], index: 1, kind: input, shape index: {}]   ;;  %s245_s2 = inlined_call_operand.hbm [shape: f32[8,128], index: 2, kind: input, shape index: {}]   ;;  %s246_s3 = inlined_call_operand.hbm [shape: f32[2,8,128], index: 3, kind: output, shape index: {}]  }
   0x1   :  { %9 = vsyncpa [#allocation3], 0 }
   0x2   :  { %10 = vsyncpa [#allocation8], 0 }
   0x3   :  { %11 = vsyncpa [#allocation4], 0  ;;  %s17_s14 = sshll.u32 %s243_s0, 4  ;;  %s26_s17 = sshll.u32 %s244_s1, 4  ;;  %s18_s14 = int_to_ptr.hbm [resolvable:$true] %s17_s14  ;;  %s27_s17 = int_to_ptr.hbm [resolvable:$true] %s26_s17 }
   0x4   :  { %s205_s18 = smov [#allocation2]   ;;  %s206_s19 = smov [#allocation6]  }
   0x5   :  { %20 = dma.hbm_to_smem %s18_s14, 16, %s205_s18, [#allocation5]  }
   0x6   :  { %s28_s20 = sshll.u32 %s206_s19, 4  ;;  %s37_s23 = sshll.u32 %s245_s2, 4  ;;  %s29_s20 = int_to_ptr.vmem [resolvable:$true] %s28_s20  ;;  %s38_s23 = int_to_ptr.hbm [resolvable:$true] %s37_s23 }
   0x7   :  { %31 = dma.hbm_to_vmem [thread:$0]  %s27_s17, 128, %s29_s20, [#allocation3]  }
   0x8   :  { %s207_s24 = smov [#allocation7]  }
   0x9   :  { %s39_s25 = sshll.u32 %s207_s24, 4  ;;  %s40_s25 = int_to_ptr.vmem [resolvable:$true] %s39_s25 }
   0xa   :  { %42 = dma.hbm_to_vmem [thread:$0]  %s38_s23, 128, %s40_s25, [#allocation8]  }
   0xb   :  { %197 = dma.done.wait [#allocation5], 16  }
   0xc   :  { %198 = vsyncadd [#allocation5], 4294967280 }
   0xd   :  { %199 = dma.done.wait [#allocation3], 128  }
   0xe   :  { %200 = vsyncadd [#allocation3], 4294967168 }
   0xf   :  { %201 = dma.done.wait [#allocation8], 128  }
  0x10   :  { %202 = vsyncadd [#allocation8], 4294967168 }
  0x11   :  { %55 = sfence }
  0x12   :  { %s56_s0 = sld [smem:[#allocation2]]  ;;  %v62_v0 = vld [vmem:[#allocation6] sm:$0xff]  ;;  %v63_v1 = vld [vmem:[#allocation7] sm:$0xff]  ;;  %s208_s29 = smov [#allocation9]  }
  0x13   :  { %s102_s1 = sld [smem:[#allocation2 + $0x1]]  ;;  %s85_s30 = sshll.u32 %s208_s29, 4  ;;  %s86_s30 = int_to_ptr.vmem [resolvable:$true] %s85_s30 }
  0x14   :  { %s103_s26 = sld [smem:[#allocation2 + $0x2]]  ;;  %s87_s6 = sshll.u32 %s246_s3, 4  ;;  %s88_s6 = int_to_ptr.hbm [resolvable:$true] %s87_s6 }
  0x15   :  { %s104_s27 = sld [smem:[#allocation2 + $0x3]]  ;;  %s209_s7 = smov 128  }
  0x16   :  { %s105_s2 = sld [smem:[#allocation2 + $0x4]]  ;;  %s210_s8 = smov 8  }
  0x17   :  { %s106_s28 = sld [smem:[#allocation2 + $0x5]] }
  0x18   :  { %v64_v2 = vstv %s56_s0 }
  0x19   :  { %v65_v3 = vmul.f32 %v64_v2, %v62_v0  ;;  %v66_v4 = vstv %s102_s1 }
  0x1a   :  { %v67_v5 = vmul.f32 %v66_v4, %v63_v1  ;;  %v69_v6 = vstv %s103_s26 }
  0x1b   :  { %v72_v7 = vstv %s104_s27 }
  0x1c   :  { %v68_v8 = vadd.f32 %v67_v5, %v65_v3  ;;  %v73_v9 = vmul.f32 %v72_v7, %v62_v0  ;;  %v74_v10 = vstv %s105_s2 }
  0x1d   :  { %v75_v11 = vmul.f32 %v74_v10, %v63_v1  ;;  %v77_v13 = vstv %s106_s28 }
  0x1e   :  { %v70_v12 = vadd.f32 %v69_v6, %v68_v8 }
  0x1f   :  { %v76_v14 = vadd.f32 %v75_v11, %v73_v9 }
  0x20   :  { %71 = vst [vmem:[#allocation9] sm:$0xff] %v70_v12 }
  0x21   :  { %v78_v15 = vadd.f32 %v77_v13, %v76_v14 }
  0x23   :  { %80 = vst [vmem:[#allocation9 + $0x8] sm:$0xff] %v78_v15 }
  0x24   :  { %93 = dma.vmem_to_hbm [thread:$0]  %s86_s30, 256, %s88_s6, [#allocation4], %s209_s7, %s209_s7, %s210_s8  }
  0x25   :  { %203 = dma.done.wait [#allocation4], 256  }
  0x26   :  { %204 = vsyncadd [#allocation4], 4294967040 }
  0x27   :  { %98 = vsyncpa [#allocation3], 1 }
  0x28   :  { %99 = vsyncpa [#allocation8], 1 }
  0x29   :  { %100 = vsyncpa [#allocation4], 1 }
  0x2a   :  { %101 = vsyncpa [#allocation5], 1 }

</bundles_post_ra>
